<compile_context>
chip_gen: v7x
topology: tpu7x:2x2x1
jax: 0.10.0
libtpu: 0.0.40
codegen_flags: <defaults>
</compile_context>

<pallas_src>
import functools

import jax
import jax.numpy as jnp
from jax.experimental import pallas as pl
from jax.experimental.pallas import tpu as pltpu

NEG_SLOPE = 0.2                      # GATConv default negative_slope
LOG2E = 1.4426950408889634           # attention params pre-scaled by this -> exp2 in-kernel
MASK_NEG = -1e30                     # finite "minus infinity" for masked (non-edge) scores


# --------------------------------------------------------------------------------------
# Kernel A: per-row-tile projection
# --------------------------------------------------------------------------------------
def project_kernel(x_ref, w_ref, h1_ref, adst_ref, asrc_ref, *, f_out):
    """h_aug = x @ [W | log2e*W@att_dst^T | log2e*W@att_src^T]   (one MXU matmul).

    Outputs:
      h1_ref   [Tq, f_out+1] bf16 : [h | 1]  (ones column -> softmax denominator falls out
                                              of the aggregation matmul in kernel B)
      adst_ref [Tq, 1]       f32  : log2(e) * (h_i . att_dst)
      asrc_ref [Tq, 1]       f32  : log2(e) * (h_i . att_src)
    """
    h_aug = jnp.dot(x_ref[...], w_ref[...], preferred_element_type=jnp.float32)
    h1_ref[:, :f_out] = h_aug[:, :f_out].astype(h1_ref.dtype)
    h1_ref[:, f_out:f_out + 1] = jnp.ones((h_aug.shape[0], 1), dtype=h1_ref.dtype)
    adst_ref[...] = h_aug[:, f_out:f_out + 1]
    asrc_ref[...] = h_aug[:, f_out + 1:f_out + 2]


# --------------------------------------------------------------------------------------
# Kernel B: flash-style masked attention + aggregation (online softmax in log2 domain)
# --------------------------------------------------------------------------------------
def attn_kernel(adst_ref, asrc_ref, mask_ref, h1_ref, o_ref, m_sc, acc_sc,
                *, f_out, apply_relu):
    k = pl.program_id(1)

    @pl.when(k == 0)
    def _():
        m_sc[...] = jnp.full_like(m_sc, MASK_NEG)
        acc_sc[...] = jnp.zeros_like(acc_sc)

    # Scores already in log2 domain (params pre-scaled by log2(e)); LeakyReLU commutes
    # with the positive scale, so max(e, 0.2*e) is exact.
    e = adst_ref[...] + asrc_ref[...]                    # [Tq,1] + [1,Tk] -> [Tq,Tk]
    e = jnp.maximum(e, NEG_SLOPE * e)                    # LeakyReLU(0.2)
    e = jnp.where(mask_ref[...] != 0, e, MASK_NEG)       # int8 mask -> additive -inf-ish

    m_prev = m_sc[...]
    m_new = jnp.maximum(m_prev, jnp.max(e, axis=-1, keepdims=True))
    alpha = jnp.exp2(m_prev - m_new)                     # rescale of running accumulator
    p = jnp.exp2(e - m_new)                              # masked entries underflow to 0
    # NOTE: a fully-masked leading tile leaves p==1 garbage in acc, but self loops
    # guarantee every row later sees a real edge, and alpha=exp2(-1e30 - m_real)=0 wipes it.

    # bf16 x bf16 -> f32 MXU matmul; last column of h1 is ones -> row-sum (denominator).
    acc_sc[...] = alpha * acc_sc[...] + jnp.dot(
        p.astype(jnp.bfloat16), h1_ref[...], preferred_element_type=jnp.float32)
    m_sc[...] = m_new

    @pl.when(k == pl.num_programs(1) - 1)
    def _():
        acc = acc_sc[...]
        inv = pl.reciprocal(acc[:, f_out:f_out + 1], approx=True)   # EUP reciprocal
        out = acc[:, :f_out] * inv
        if apply_relu:
            out = jnp.maximum(out, 0.0)                  # ReLU between layers
        o_ref[...] = out.astype(o_ref.dtype)


# --------------------------------------------------------------------------------------
# Per-layer wrapper + full forward
# --------------------------------------------------------------------------------------
def gat_layer(x, mask_i8, w_aug, f_out, apply_relu, *, tq=128, tk=128):
    n, f_in = x.shape

    h1, a_dst, a_src_col = pl.pallas_call(
        functools.partial(project_kernel, f_out=f_out),
        out_shape=(
            jax.ShapeDtypeStruct((n, f_out + 1), jnp.bfloat16),
            jax.ShapeDtypeStruct((n, 1), jnp.float32),
            jax.ShapeDtypeStruct((n, 1), jnp.float32),
        ),
        grid_spec=pltpu.PrefetchScalarGridSpec(
            num_scalar_prefetch=0,
            grid=(n // tq,),
            in_specs=[
                pl.BlockSpec((tq, f_in), lambda i: (i, 0)),
                pl.BlockSpec((f_in, f_out + 2), lambda i: (0, 0)),
            ],
            out_specs=[
                pl.BlockSpec((tq, f_out + 1), lambda i: (i, 0)),
                pl.BlockSpec((tq, 1), lambda i: (i, 0)),
                pl.BlockSpec((tq, 1), lambda i: (i, 0)),
            ],
        ),
        compiler_params=pltpu.CompilerParams(dimension_semantics=("parallel",)),
    )(x, w_aug)

    # [N,1] -> [1,N]: same flat order, a metadata reshape (no transpose / data movement).
    a_src = a_src_col.reshape(1, n)

    out = pl.pallas_call(
        functools.partial(attn_kernel, f_out=f_out, apply_relu=apply_relu),
        out_shape=jax.ShapeDtypeStruct((n, f_out), jnp.float32),
        grid_spec=pltpu.PrefetchScalarGridSpec(
            num_scalar_prefetch=0,
            grid=(n // tq, n // tk),                     # (row tiles, source-col tiles)
            in_specs=[
                pl.BlockSpec((tq, 1), lambda i, k: (i, 0)),        # a_dst
                pl.BlockSpec((1, tk), lambda i, k: (0, k)),        # a_src
                pl.BlockSpec((tq, tk), lambda i, k: (i, k)),       # int8 adjacency mask
                pl.BlockSpec((tk, f_out + 1), lambda i, k: (k, 0)),  # [h | 1] bf16
            ],
            out_specs=pl.BlockSpec((tq, f_out), lambda i, k: (i, 0)),  # resident over k
            scratch_shapes=[
                pltpu.VMEM((tq, 1), jnp.float32),                  # running max
                pltpu.VMEM((tq, f_out + 1), jnp.float32),          # running [acc | rowsum]
            ],
        ),
        compiler_params=pltpu.CompilerParams(
            dimension_semantics=("parallel", "arbitrary"),
            vmem_limit_bytes=32 * 1024 * 1024,
        ),
    )(a_dst, a_src, mask_i8, h1)
    return out


def gat_forward(x, mask_i8, params, *, tq=128, tk=128):
    """params: list of (W [F_in,F_out], att_src [1,F_out], att_dst [1,F_out])."""
    # TODO(synk): F.dropout is identity here (eval mode); type_norm != 'batch' so the
    # BatchNorm1d branch is never taken.
    n_layers = len(params)
    for li, (w, a_s, a_d) in enumerate(params):
        f_out = w.shape[1]
        # Fold att_dst / att_src (pre-scaled by log2(e) for in-kernel exp2) into the matmul.
        w_aug = jnp.concatenate([w, LOG2E * (w @ a_d.T), LOG2E * (w @ a_s.T)], axis=1)
        x = gat_layer(x, mask_i8, w_aug, f_out,
                      apply_relu=(li != n_layers - 1), tq=tq, tk=tk)
    return x


# ---------- pure-JAX reference (same dense-adjacency semantics, f32 throughout) ----------
def gat_layer_ref(x, w, a_s, a_d, adj, apply_relu):
    h = x @ w
    ad = (h * a_d).sum(-1, keepdims=True)
    asr = (h * a_s).sum(-1)
    e = ad + asr[None, :]
    e = jnp.where(e > 0, e, NEG_SLOPE * e)
    e = jnp.where(adj > 0, e, -1e30)
    p = jnp.exp(e - e.max(-1, keepdims=True)) * adj
    alpha = p / p.sum(-1, keepdims=True)
    out = alpha @ h
    return jnp.maximum(out, 0.0) if apply_relu else out


def gat_forward_ref(x, adj, params):
    n_layers = len(params)
    for i, (w, a_s, a_d) in enumerate(params):
        x = gat_layer_ref(x, w, a_s, a_d, adj, apply_relu=(i != n_layers - 1))
    return x


if __name__ == "__main__":
    # Module config (args): num_layers=3, num_feats=32, dim_hidden=32, num_classes=8,
    # type_norm='None', dropout=0.5 (inactive in eval), dataset != 'obgn-arxiv'.
    N = 256         # nodes (divisible by the 128 tile so the 2-D grid is exercised)
    E = 1024        # edges
    num_feats, dim_hidden, num_classes, num_layers = 32, 32, 8, 3
    TQ = TK = 128

    key = jax.random.PRNGKey(0)
    k_x, k_src, k_dst, k_p = jax.random.split(key, 4)

    x = jax.random.normal(k_x, (N, num_feats), dtype=jnp.float32)
    src = jax.random.randint(k_src, (E,), 0, N)
    dst = jax.random.randint(k_dst, (E,), 0, N)
    edge_index = jnp.stack([src, dst], axis=0)   # [2, E], row 0 = source, row 1 = target

    # Dense adjacency with self loops: adj[target, source] = 1.
    # NOTE: densification deduplicates parallel edges (fine for simple graphs).
    adj = jnp.zeros((N, N), jnp.float32).at[edge_index[1], edge_index[0]].set(1.0)
    adj = jnp.maximum(adj, jnp.eye(N, dtype=jnp.float32))       # add_self_loops=True
    mask_i8 = adj.astype(jnp.int8)                              # compact mask streamed to the kernel

    # Deterministic parameter init (glorot-ish), one (W, att_src, att_dst) triple per layer.
    dims = [num_feats] + [dim_hidden] * (num_layers - 1) + [num_classes]
    params = []
    for li in range(num_layers):
        f_in, f_out = dims[li], dims[li + 1]
        k_p, kw, ks, kd = jax.random.split(k_p, 4)
        scale_w = (2.0 / (f_in + f_out)) ** 0.5
        w = scale_w * jax.random.normal(kw, (f_in, f_out), dtype=jnp.float32)
        scale_a = (2.0 / (1 + f_out)) ** 0.5
        a_s = scale_a * jax.random.normal(ks, (1, f_out), dtype=jnp.float32)
        a_d = scale_a * jax.random.normal(kd, (1, f_out), dtype=jnp.float32)
        params.append((w, a_s, a_d))

    out = gat_forward(x, mask_i8, params, tq=TQ, tk=TK)
    out = jax.block_until_ready(out)

    ref = gat_forward_ref(x, adj, params)
    assert out.shape == (N, num_classes)
    # Tolerance accounts for the bf16 p/[h|1] aggregation operands (f32 accumulation) and
    # the approx EUP reciprocal used for softmax normalization.
    assert jnp.allclose(out, ref, rtol=5e-2, atol=5e-2), "Pallas GAT mismatch vs reference"

    print("KERNEL_OK")
</pallas_src>

<mosaic_0001>
module attributes {stable_mosaic.version = 11 : i64} {
  func.func @project_kernel(%arg0: i32, %arg1: memref<128x32xf32, #tpu.memory_space<vmem>>, %arg2: memref<32x34xf32, #tpu.memory_space<vmem>>, %arg3: memref<128x33xbf16, #tpu.memory_space<vmem>>, %arg4: memref<128x1xf32, #tpu.memory_space<vmem>>, %arg5: memref<128x1xf32, #tpu.memory_space<vmem>>) attributes {dimension_semantics = [#tpu.dimension_semantics<parallel>], iteration_bounds = array<i64: 2>, scalar_prefetch = 0 : i64, scratch_operands = 0 : i64, tpu.core_type = #tpu.core_type<tc>, window_params = [{transform_indices = @transform_0, window_bounds = array<i64: 128, 32>}, {pipeline_mode = #tpu.pipeline_mode<synchronous>, transform_indices = @transform_1, window_bounds = array<i64: 32, 34>}, {transform_indices = @transform_2, window_bounds = array<i64: 128, 33>}, {transform_indices = @transform_3, window_bounds = array<i64: 128, 1>}, {transform_indices = @transform_4, window_bounds = array<i64: 128, 1>}]} {
    %c0 = arith.constant 0 : index
    %c0_0 = arith.constant 0 : index
    %0 = vector.load %arg1[%c0, %c0_0] : memref<128x32xf32, #tpu.memory_space<vmem>>, vector<128x32xf32>
    %c0_1 = arith.constant 0 : index
    %c0_2 = arith.constant 0 : index
    %1 = vector.load %arg2[%c0_1, %c0_2] : memref<32x34xf32, #tpu.memory_space<vmem>>, vector<32x34xf32>
    %cst = arith.constant dense<0.000000e+00> : vector<128x34xf32>
    %2 = tpu.matmul %0, %1, %cst {dimension_numbers = #tpu.dot_dimension_numbers<[1], [0], [0], [1], [0, 0, 1, 1], [], []>} : vector<128x32xf32>, vector<32x34xf32>, vector<128x34xf32> -> vector<128x34xf32>
    %3 = vector.extract_strided_slice %2 {offsets = [0, 0], sizes = [128, 32], strides = [1, 1]} : vector<128x34xf32> to vector<128x32xf32>
    %4 = arith.truncf %3 : vector<128x32xf32> to vector<128x32xbf16>
    %c0_3 = arith.constant 0 : index
    %c0_4 = arith.constant 0 : index
    %5 = vector.load %arg3[%c0_3, %c0_4] : memref<128x33xbf16, #tpu.memory_space<vmem>>, vector<128x32xbf16>
    tpu.vector_store %arg3[%c0_3, %c0_4], %4 {strides = array<i32>} : memref<128x33xbf16, #tpu.memory_space<vmem>>, vector<128x32xbf16>,
    %cst_5 = arith.constant 1.000000e+00 : bf16
    %6 = vector.broadcast %cst_5 : bf16 to vector<128x1xbf16>
    %c0_6 = arith.constant 0 : index
    %c32 = arith.constant 32 : index
    %7 = vector.load %arg3[%c0_6, %c32] : memref<128x33xbf16, #tpu.memory_space<vmem>>, vector<128x1xbf16>
    tpu.vector_store %arg3[%c0_6, %c32], %6 {strides = array<i32>} : memref<128x33xbf16, #tpu.memory_space<vmem>>, vector<128x1xbf16>,
    %8 = vector.extract_strided_slice %2 {offsets = [0, 32], sizes = [128, 1], strides = [1, 1]} : vector<128x34xf32> to vector<128x1xf32>
    %c0_7 = arith.constant 0 : index
    %c0_8 = arith.constant 0 : index
    %9 = vector.load %arg4[%c0_7, %c0_8] : memref<128x1xf32, #tpu.memory_space<vmem>>, vector<128x1xf32>
    tpu.vector_store %arg4[%c0_7, %c0_8], %8 {strides = array<i32>} : memref<128x1xf32, #tpu.memory_space<vmem>>, vector<128x1xf32>,
    %10 = vector.extract_strided_slice %2 {offsets = [0, 33], sizes = [128, 1], strides = [1, 1]} : vector<128x34xf32> to vector<128x1xf32>
    %c0_9 = arith.constant 0 : index
    %c0_10 = arith.constant 0 : index
    %11 = vector.load %arg5[%c0_9, %c0_10] : memref<128x1xf32, #tpu.memory_space<vmem>>, vector<128x1xf32>
    tpu.vector_store %arg5[%c0_9, %c0_10], %10 {strides = array<i32>} : memref<128x1xf32, #tpu.memory_space<vmem>>, vector<128x1xf32>,
    return
  }
  func.func @transform_0(%arg0: i32) -> (i32, i32) {
    %c0_i32 = arith.constant 0 : i32
    %c0_i32_0 = arith.constant 0 : i32
    return %arg0, %c0_i32 : i32, i32
  }
  func.func @transform_1(%arg0: i32) -> (i32, i32) {
    %c0_i32 = arith.constant 0 : i32
    %c0_i32_0 = arith.constant 0 : i32
    %c0_i32_1 = arith.constant 0 : i32
    return %c0_i32, %c0_i32_0 : i32, i32
  }
  func.func @transform_2(%arg0: i32) -> (i32, i32) {
    %c0_i32 = arith.constant 0 : i32
    %c0_i32_0 = arith.constant 0 : i32
    return %arg0, %c0_i32 : i32, i32
  }
  func.func @transform_3(%arg0: i32) -> (i32, i32) {
    %c0_i32 = arith.constant 0 : i32
    %c0_i32_0 = arith.constant 0 : i32
    return %arg0, %c0_i32 : i32, i32
  }
  func.func @transform_4(%arg0: i32) -> (i32, i32) {
    %c0_i32 = arith.constant 0 : i32
    %c0_i32_0 = arith.constant 0 : i32
    return %arg0, %c0_i32 : i32, i32
  }
}

</mosaic_0001>

<bundles_post_ra>
// kernel: tpu_custom_call.1
= control target key start
LH: loop header
LB: loop body
LE: loop exit
PB: predicated region body
PF: predicated region fallthrough
CT: control target
= control target key end

     0   :  { %s984_s15 = smov 0   ;;  %s1250_s0 = inlined_call_operand.vmem [shape: f32[256,32], index: 0, kind: input, shape index: {}]   ;;  %s1251_s1 = inlined_call_operand.vmem [shape: f32[32,34], index: 1, kind: input, shape index: {}]   ;;  %s1252_s2 = inlined_call_operand.vmem [shape: bf16[256,33], index: 2, kind: output, shape index: {0}]   ;;  %s1253_s3 = inlined_call_operand.vmem [shape: f32[256,1], index: 3, kind: output, shape index: {1}]   ;;  %s1254_s4 = inlined_call_operand.vmem [shape: f32[256,1], index: 4, kind: output, shape index: {2}]  }
   0x1 LB: > { %s810_s16 = sadd.s32 4294967295, %s954_s15   ;;  %p814_p0 = scmp.ge.s32.totalorder %s954_s15, 1  ;;  %s954_s15 = sphi %s984_s15, %s15_s15  }
   0x2   : > { %p168_p1 = scmp.lt.s32.totalorder %s954_s15, 3 }
   0x4   : > { %p169_p2 = pnand %p814_p0, %p168_p1 }
   0x5   : > { %v245_v0 = vld [vmem:[%s1251_s1] sm:$0xff] (!%p169_p2)  ;;  %v246_v1 = vld [vmem:[%s1251_s1 + $0x8] sm:$0xff] (!%p169_p2)  ;;  %v247_v2 = vld [vmem:[%s1251_s1 + $0x10] sm:$0xff] (!%p169_p2)  ;;  %s815_s23 = sshll.u32 (!%p169_p2), %s810_s16, 4  ;;  %vm249_vm0 = vcmask (!%p169_p2), 261120   ;;  %vm507_vm1 = vcmask (!%p169_p2), 257024  }
   0x6   : > { %172 = sbr.rel (%p169_p2) target bundleno = 407 (0x197), region = 28  ;;  %v925_v3 = vpack.c.bf16 (!%p169_p2), %v246_v1, %v245_v0  ;;  %v248_v4 = vld [vmem:[%s1251_s1 + $0x18] sm:$0xff] (!%p169_p2)  ;;  %p205_p3 = scmp.lt.s32.totalorder (!%p169_p2), %s815_s23, 31  ;;  %vm524_vm2 = vcmask (!%p169_p2), 265472   ;;  %v957_v30 = vmov (!%p169_p2), 1065369472  }
   0x7   : > { %v929_v5 = vpack.c.bf16 (!%p169_p2), %v248_v4, %v247_v2  ;;  %s956_s8 = smov (!%p169_p2), 96   ;;  %s958_s9 = smov (!%p169_p2), 95   ;;  %vm605_vm3 = vcmask (!%p169_p2), 7168  }
   0x8   : > { %926 = vmatprep.subr.bf16.mxu0 (!%p169_p2), %v925_v3  ;;  %933 = vmatprep.subr.bf16.mxu1 (!%p169_p2), %v925_v3 }
   0x9   : > { %928 = vmatpush3.bf16.msra.mxu0 (!%p169_p2), %v925_v3  ;;  %935 = vmatpush3.bf16.msra.mxu1 (!%p169_p2), %v925_v3 }
   0xa   : > { %930 = vmatprep.subr.bf16.mxu0 (!%p169_p2), %v929_v5  ;;  %934 = vmatprep.subr.bf16.mxu1 (!%p169_p2), %v929_v5 }
   0xd   : > { %s1256_s23 = smov (!%p205_p3, %s815_s23), 31  ;;  %932 = vmatpush3.bf16.msra.mxu0 %v929_v5  ;;  %936 = vmatpush3.bf16.msra.mxu1 %v929_v5 }
   0xe   : > { %s1007_s26 = sshll.u32 %s1256_s23, 3  ;;  %s818_s30 = sshll.u32 %s1256_s23, 2 }
   0xf   : > { %s1013_s29 = scalar_lea.vmem %s1250_s0, %s1007_s26  ;;  %s1051_s7 = scalar_lea.vmem %s1252_s2, %s818_s30 }
  0x10   : > { %v229_v6 = vld [vmem:[%s1013_s29] sm:$0xff]  ;;  %v230_v8 = vld [vmem:[%s1013_s29 + $0x8] sm:$0xff]  ;;  %v231_v10 = vld [vmem:[%s1013_s29 + $0x10] sm:$0xff]  ;;  %s1175_s12 = scalar_lea.vmem %s1253_s3, %s1007_s26  ;;  %s1185_s16 = scalar_lea.vmem %s1254_s4, %s1007_s26 }
  0x11   : > { %v237_v7 = vld [vmem:[%s1013_s29 + $0x40] sm:$0xff]  ;;  %v238_v9 = vld [vmem:[%s1013_s29 + $0x48] sm:$0xff]  ;;  %901 = vmatprep.mubr.msk.f32.mxu0 %vm249_vm0, %v229_v6  ;;  %v239_v11 = vld [vmem:[%s1013_s29 + $0x50] sm:$0xff] }
  0x12   : > { %913 = vmatprep.mubr.msk.f32.mxu1 %vm249_vm0, %v237_v7  ;;  %902 = vmatmul.mubr.msk.f32.vlgmr.msra.gmra.mrb[0].mxu0 %vm249_vm0, %v230_v8  ;;  %v232_v12 = vld [vmem:[%s1013_s29 + $0x18] sm:$0xff]  ;;  %v233_v14 = vld [vmem:[%s1013_s29 + $0x20] sm:$0xff]  ;;  %v234_v16 = vld [vmem:[%s1013_s29 + $0x28] sm:$0xff] }
  0x13   : > { %914 = vmatmul.mubr.msk.f32.vlgmr.msra.gmra.mrb[0].mxu1 %vm249_vm0, %v238_v9  ;;  %904 = vmatprep.mubr.msk.f32.mxu0 %vm249_vm0, %v231_v10  ;;  %v240_v13 = vld [vmem:[%s1013_s29 + $0x58] sm:$0xff]  ;;  %v241_v15 = vld [vmem:[%s1013_s29 + $0x60] sm:$0xff]  ;;  %v242_v17 = vld [vmem:[%s1013_s29 + $0x68] sm:$0xff] }
  0x14   : > { %916 = vmatprep.mubr.msk.f32.mxu1 %vm249_vm0, %v239_v11  ;;  %v235_v18 = vld [vmem:[%s1013_s29 + $0x30] sm:$0xff]  ;;  %v236_v20 = vld [vmem:[%s1013_s29 + $0x38] sm:$0xff] }
  0x15   : > { %v243_v19 = vld [vmem:[%s1013_s29 + $0x70] sm:$0xff]  ;;  %v244_v21 = vld [vmem:[%s1013_s29 + $0x78] sm:$0xff] }
  0x16   : > { %905 = vmatmul.mubr.msk.f32.gmra.mrb[2].mxu0 %vm249_vm0, %v232_v12 }
  0x17   : > { %917 = vmatmul.mubr.msk.f32.gmra.mrb[2].mxu1 %vm249_vm0, %v240_v13  ;;  %907 = vmatprep.mubr.msk.f32.mxu0 %vm249_vm0, %v233_v14 }
  0x18   : > { %919 = vmatprep.mubr.msk.f32.mxu1 %vm249_vm0, %v241_v15 }
  0x1a   : > { %908 = vmatmul.mubr.msk.f32.gmra.mrb[4].mxu0 %vm249_vm0, %v234_v16 }
  0x1b   : > { %920 = vmatmul.mubr.msk.f32.gmra.mrb[4].mxu1 %vm249_vm0, %v242_v17  ;;  %910 = vmatprep.mubr.msk.f32.mxu0 %vm249_vm0, %v235_v18 }
  0x1c   : > { %922 = vmatprep.mubr.msk.f32.mxu1 %vm249_vm0, %v243_v19 }
  0x1e   : > { %911 = vmatmul.mubr.msk.f32.gmra.mrb[6].mxu0 %vm249_vm0, %v236_v20 }
  0x1f   : > { %923 = vmatmul.mubr.msk.f32.gmra.mrb[6].mxu1 %vm249_vm0, %v244_v21 }
  0xe5   : > { %v903_v22 = vpop.f32.mrb[0].mxu0 }
  0xe6   : > { %v915_v23 = vpop.f32.mrb[0].mxu1  ;;  %v858_v24 = vpack.c.bf16 %v903_v22, %v903_v22  ;;  %559 = vrot.lane.b32.xlu0 %v903_v22, %s956_s8  ;;  %v364_v27 = vpop.f32.mrb[1].mxu0 }
  0xe7   : > { %v866_v25 = vpack.c.bf16 %v915_v23, %v915_v23  ;;  %575 = vrot.lane.b32.xlu1 %v915_v23, %s956_s8  ;;  %v1054_v26 = vpop.f32.mrb[1].mxu1  ;;  %v857_v29 = vpack.c.bf16 %v364_v27, %v364_v27 }
  0xe8   : > { %v865_v28 = vpack.c.bf16 %v1054_v26, %v1054_v26  ;;  %509 = vst.msk [vmem:[%s1051_s7 + $0x4] sm:$0xf] %vm507_vm1, %v858_v24 }
  0xe9   : > { %517 = vst.msk [vmem:[%s1051_s7 + $0x24] sm:$0xf] %vm507_vm1, %v866_v25  ;;  %508 = vst.msk [vmem:[%s1051_s7] sm:$0xf] %vm507_vm1, %v857_v29  ;;  %v906_v31 = vpop.f32.mrb[2].mxu0 }
  0xea   : > { %526 = vst.msk [vmem:[%s1051_s7 + $0x4] sm:$0xf] %vm524_vm2, %v957_v30  ;;  %534 = vst.msk [vmem:[%s1051_s7 + $0x24] sm:$0xf] %vm524_vm2, %v957_v30  ;;  %v918_v32 = vpop.f32.mrb[2].mxu1  ;;  %557 = vrot.lane.b32.xlu0 %v364_v27, %s956_s8  ;;  %v860_v33 = vpack.c.bf16 %v906_v31, %v906_v31  ;;  %v374_v34 = vpop.f32.mrb[3].mxu0 }
  0xeb   : > { %516 = vst.msk [vmem:[%s1051_s7 + $0x20] sm:$0xf] %vm507_vm1, %v865_v28  ;;  %624 = vrot.lane.b32.xlu1 %v903_v22, %s958_s9  ;;  %v868_v35 = vpack.c.bf16 %v918_v32, %v918_v32  ;;  %v414_v36 = vpop.f32.mrb[3].mxu1  ;;  %v859_v37 = vpack.c.bf16 %v374_v34, %v374_v34 }
  0xec   : > { %533 = vst.msk [vmem:[%s1051_s7 + $0x20] sm:$0xf] %vm524_vm2, %v957_v30  ;;  %525 = vst.msk [vmem:[%s1051_s7] sm:$0xf] %vm524_vm2, %v957_v30  ;;  %v867_v38 = vpack.c.bf16 %v414_v36, %v414_v36 }
  0xed   : > { %511 = vst.msk [vmem:[%s1051_s7 + $0xc] sm:$0xf] %vm507_vm1, %v860_v33  ;;  %519 = vst.msk [vmem:[%s1051_s7 + $0x2c] sm:$0xf] %vm507_vm1, %v868_v35  ;;  %v909_v39 = vpop.f32.mrb[4].mxu0 }
  0xee   : > { %528 = vst.msk [vmem:[%s1051_s7 + $0xc] sm:$0xf] %vm524_vm2, %v957_v30  ;;  %536 = vst.msk [vmem:[%s1051_s7 + $0x2c] sm:$0xf] %vm524_vm2, %v957_v30  ;;  %v921_v40 = vpop.f32.mrb[4].mxu1  ;;  %573 = vrot.lane.b32.xlu0 %v1054_v26, %s956_s8  ;;  %v862_v41 = vpack.c.bf16 %v909_v39, %v909_v39  ;;  %v384_v42 = vpop.f32.mrb[5].mxu0 }
  0xef   : > { %510 = vst.msk [vmem:[%s1051_s7 + $0x8] sm:$0xf] %vm507_vm1, %v859_v37  ;;  %518 = vst.msk [vmem:[%s1051_s7 + $0x28] sm:$0xf] %vm507_vm1, %v867_v38  ;;  %640 = vrot.lane.b32.xlu1 %v915_v23, %s958_s9  ;;  %v870_v43 = vpack.c.bf16 %v921_v40, %v921_v40  ;;  %v424_v44 = vpop.f32.mrb[5].mxu1  ;;  %v861_v45 = vpack.c.bf16 %v384_v42, %v384_v42 }
  0xf0   : > { %527 = vst.msk [vmem:[%s1051_s7 + $0x8] sm:$0xf] %vm524_vm2, %v957_v30  ;;  %535 = vst.msk [vmem:[%s1051_s7 + $0x28] sm:$0xf] %vm524_vm2, %v957_v30  ;;  %v869_v46 = vpack.c.bf16 %v424_v44, %v424_v44 }
  0xf1   : > { %513 = vst.msk [vmem:[%s1051_s7 + $0x14] sm:$0xf] %vm507_vm1, %v862_v41  ;;  %521 = vst.msk [vmem:[%s1051_s7 + $0x34] sm:$0xf] %vm507_vm1, %v870_v43  ;;  %v912_v47 = vpop.f32.mrb[6].mxu0 }
  0xf2   : > { %530 = vst.msk [vmem:[%s1051_s7 + $0x14] sm:$0xf] %vm524_vm2, %v957_v30  ;;  %538 = vst.msk [vmem:[%s1051_s7 + $0x34] sm:$0xf] %vm524_vm2, %v957_v30  ;;  %v924_v48 = vpop.f32.mrb[6].mxu1  ;;  %622 = vrot.lane.b32.xlu0 %v364_v27, %s958_s9  ;;  %v864_v49 = vpack.c.bf16 %v912_v47, %v912_v47  ;;  %v394_v50 = vpop.f32.mrb[7].mxu0 }
  0xf3   : > { %512 = vst.msk [vmem:[%s1051_s7 + $0x10] sm:$0xf] %vm507_vm1, %v861_v45  ;;  %520 = vst.msk [vmem:[%s1051_s7 + $0x30] sm:$0xf] %vm507_vm1, %v869_v46  ;;  %563 = vrot.lane.b32.xlu1 %v906_v31, %s956_s8  ;;  %v872_v51 = vpack.c.bf16 %v924_v48, %v924_v48  ;;  %v434_v52 = vpop.f32.mrb[7].mxu1  ;;  %v863_v53 = vpack.c.bf16 %v394_v50, %v394_v50 }
  0xf4   : > { %529 = vst.msk [vmem:[%s1051_s7 + $0x10] sm:$0xf] %vm524_vm2, %v957_v30  ;;  %537 = vst.msk [vmem:[%s1051_s7 + $0x30] sm:$0xf] %vm524_vm2, %v957_v30  ;;  %v871_v54 = vpack.c.bf16 %v434_v52, %v434_v52 }
  0xf5   : > { %515 = vst.msk [vmem:[%s1051_s7 + $0x1c] sm:$0xf] %vm507_vm1, %v864_v49  ;;  %523 = vst.msk [vmem:[%s1051_s7 + $0x3c] sm:$0xf] %vm507_vm1, %v872_v51 }
  0xf6   : > { %532 = vst.msk [vmem:[%s1051_s7 + $0x1c] sm:$0xf] %vm524_vm2, %v957_v30  ;;  %540 = vst.msk [vmem:[%s1051_s7 + $0x3c] sm:$0xf] %vm524_vm2, %v957_v30  ;;  %638 = vrot.lane.b32.xlu0 %v1054_v26, %s958_s9 }
  0xf7   : > { %514 = vst.msk [vmem:[%s1051_s7 + $0x18] sm:$0xf] %vm507_vm1, %v863_v53  ;;  %522 = vst.msk [vmem:[%s1051_s7 + $0x38] sm:$0xf] %vm507_vm1, %v871_v54  ;;  %579 = vrot.lane.b32.xlu1 %v918_v32, %s956_s8 }
  0xf8   : > { %531 = vst.msk [vmem:[%s1051_s7 + $0x18] sm:$0xf] %vm524_vm2, %v957_v30  ;;  %539 = vst.msk [vmem:[%s1051_s7 + $0x38] sm:$0xf] %vm524_vm2, %v957_v30 }
  0xfa   : > { %577 = vrot.lane.b32.xlu0 %v414_v36, %s956_s8 }
  0xfb   : > { %628 = vrot.lane.b32.xlu1 %v906_v31, %s958_s9 }
  0xfe   : > { %626 = vrot.lane.b32.xlu0 %v374_v34, %s958_s9 }
  0xff   : > { %644 = vrot.lane.b32.xlu1 %v918_v32, %s958_s9 }
 0x102   : > { %642 = vrot.lane.b32.xlu0 %v414_v36, %s958_s9 }
 0x103   : > { %561 = vrot.lane.b32.xlu1 %v374_v34, %s956_s8 }
 0x106   : > { %565 = vrot.lane.b32.xlu0 %v384_v42, %s956_s8 }
 0x107   : > { %567 = vrot.lane.b32.xlu1 %v909_v39, %s956_s8 }
 0x10a   : > { %581 = vrot.lane.b32.xlu0 %v424_v44, %s956_s8 }
 0x10b   : > { %583 = vrot.lane.b32.xlu1 %v921_v40, %s956_s8 }
 0x10e   : > { %630 = vrot.lane.b32.xlu0 %v384_v42, %s958_s9 }
 0x10f   : > { %632 = vrot.lane.b32.xlu1 %v909_v39, %s958_s9 }
 0x112   : > { %646 = vrot.lane.b32.xlu0 %v424_v44, %s958_s9 }
 0x113   : > { %648 = vrot.lane.b32.xlu1 %v921_v40, %s958_s9 }
 0x116   : > { %569 = vrot.lane.b32.xlu0 %v394_v50, %s956_s8 }
 0x117   : > { %571 = vrot.lane.b32.xlu1 %v912_v47, %s956_s8 }
 0x11a   : > { %585 = vrot.lane.b32.xlu0 %v434_v52, %s956_s8 }
 0x11b   : > { %587 = vrot.lane.b32.xlu1 %v924_v48, %s956_s8 }
 0x11e   : > { %634 = vrot.lane.b32.xlu0 %v394_v50, %s958_s9 }
 0x11f   : > { %636 = vrot.lane.b32.xlu1 %v912_v47, %s958_s9 }
 0x122   : > { %650 = vrot.lane.b32.xlu0 %v434_v52, %s958_s9 }
 0x123   : > { %652 = vrot.lane.b32.xlu1 %v924_v48, %s958_s9 }
 0x158   : > { %v560_v56 = vpop.permute.xlu0 %559 }
 0x159   : > { %v576_v55 = vpop.permute.xlu1 %575  ;;  %607 = vst.msk [vmem:[%s1175_s12 + $0x8] sm:$0xff] %vm605_vm3, %v560_v56 }
 0x15a   : > { %615 = vst.msk [vmem:[%s1175_s12 + $0x48] sm:$0xff] %vm605_vm3, %v576_v55 }
 0x15c   : > { %v558_v58 = vpop.permute.xlu0 %557 }
 0x15d   : > { %v625_v57 = vpop.permute.xlu1 %624  ;;  %606 = vst.msk [vmem:[%s1175_s12] sm:$0xff] %vm605_vm3, %v558_v58 }
 0x15e   : > { %671 = vst.msk [vmem:[%s1185_s16 + $0x8] sm:$0xff] %vm605_vm3, %v625_v57 }
 0x160   : > { %v574_v60 = vpop.permute.xlu0 %573 }
 0x161   : > { %v641_v59 = vpop.permute.xlu1 %640  ;;  %614 = vst.msk [vmem:[%s1175_s12 + $0x40] sm:$0xff] %vm605_vm3, %v574_v60 }
 0x162   : > { %679 = vst.msk [vmem:[%s1185_s16 + $0x48] sm:$0xff] %vm605_vm3, %v641_v59 }
 0x164   : > { %v623_v61 = vpop.permute.xlu0 %622 }
 0x165   : > { %v564_v62 = vpop.permute.xlu1 %563  ;;  %670 = vst.msk [vmem:[%s1185_s16] sm:$0xff] %vm605_vm3, %v623_v61 }
 0x166   : > { %609 = vst.msk [vmem:[%s1175_s12 + $0x18] sm:$0xff] %vm605_vm3, %v564_v62 }
 0x168   : > { %v639_v63 = vpop.permute.xlu0 %638 }
 0x169   : > { %v580_v0 = vpop.permute.xlu1 %579  ;;  %678 = vst.msk [vmem:[%s1185_s16 + $0x40] sm:$0xff] %vm605_vm3, %v639_v63 }
 0x16a   : > { %617 = vst.msk [vmem:[%s1175_s12 + $0x58] sm:$0xff] %vm605_vm3, %v580_v0 }
 0x16c   : > { %v578_v1 = vpop.permute.xlu0 %577 }
 0x16d   : > { %v629_v2 = vpop.permute.xlu1 %628  ;;  %616 = vst.msk [vmem:[%s1175_s12 + $0x50] sm:$0xff] %vm605_vm3, %v578_v1 }
 0x16e   : > { %673 = vst.msk [vmem:[%s1185_s16 + $0x18] sm:$0xff] %vm605_vm3, %v629_v2 }
 0x170   : > { %v627_v4 = vpop.permute.xlu0 %626 }
 0x171   : > { %v645_v3 = vpop.permute.xlu1 %644  ;;  %672 = vst.msk [vmem:[%s1185_s16 + $0x10] sm:$0xff] %vm605_vm3, %v627_v4 }
 0x172   : > { %681 = vst.msk [vmem:[%s1185_s16 + $0x58] sm:$0xff] %vm605_vm3, %v645_v3 }
 0x174   : > { %v643_v5 = vpop.permute.xlu0 %642 }
 0x175   : > { %v562_v6 = vpop.permute.xlu1 %561  ;;  %680 = vst.msk [vmem:[%s1185_s16 + $0x50] sm:$0xff] %vm605_vm3, %v643_v5 }
 0x176   : > { %608 = vst.msk [vmem:[%s1175_s12 + $0x10] sm:$0xff] %vm605_vm3, %v562_v6 }
 0x178   : > { %v566_v8 = vpop.permute.xlu0 %565 }
 0x179   : > { %v568_v7 = vpop.permute.xlu1 %567  ;;  %610 = vst.msk [vmem:[%s1175_s12 + $0x20] sm:$0xff] %vm605_vm3, %v566_v8 }
 0x17a   : > { %611 = vst.msk [vmem:[%s1175_s12 + $0x28] sm:$0xff] %vm605_vm3, %v568_v7 }
 0x17c   : > { %v582_v10 = vpop.permute.xlu0 %581 }
 0x17d   : > { %v584_v9 = vpop.permute.xlu1 %583  ;;  %618 = vst.msk [vmem:[%s1175_s12 + $0x60] sm:$0xff] %vm605_vm3, %v582_v10 }
 0x17e   : > { %619 = vst.msk [vmem:[%s1175_s12 + $0x68] sm:$0xff] %vm605_vm3, %v584_v9 }
 0x180   : > { %v631_v12 = vpop.permute.xlu0 %630 }
 0x181   : > { %v633_v11 = vpop.permute.xlu1 %632  ;;  %674 = vst.msk [vmem:[%s1185_s16 + $0x20] sm:$0xff] %vm605_vm3, %v631_v12 }
 0x182   : > { %675 = vst.msk [vmem:[%s1185_s16 + $0x28] sm:$0xff] %vm605_vm3, %v633_v11 }
 0x184   : > { %v647_v14 = vpop.permute.xlu0 %646 }
 0x185   : > { %v649_v13 = vpop.permute.xlu1 %648  ;;  %682 = vst.msk [vmem:[%s1185_s16 + $0x60] sm:$0xff] %vm605_vm3, %v647_v14 }
 0x186   : > { %683 = vst.msk [vmem:[%s1185_s16 + $0x68] sm:$0xff] %vm605_vm3, %v649_v13 }
 0x188   : > { %v570_v16 = vpop.permute.xlu0 %569 }
 0x189   : > { %v572_v15 = vpop.permute.xlu1 %571  ;;  %612 = vst.msk [vmem:[%s1175_s12 + $0x30] sm:$0xff] %vm605_vm3, %v570_v16 }
 0x18a   : > { %613 = vst.msk [vmem:[%s1175_s12 + $0x38] sm:$0xff] %vm605_vm3, %v572_v15 }
 0x18c   : > { %v586_v18 = vpop.permute.xlu0 %585 }
 0x18d   : > { %v588_v17 = vpop.permute.xlu1 %587  ;;  %620 = vst.msk [vmem:[%s1175_s12 + $0x70] sm:$0xff] %vm605_vm3, %v586_v18 }
 0x18e   : > { %621 = vst.msk [vmem:[%s1175_s12 + $0x78] sm:$0xff] %vm605_vm3, %v588_v17 }
 0x190   : > { %v635_v20 = vpop.permute.xlu0 %634 }
 0x191   : > { %v637_v19 = vpop.permute.xlu1 %636  ;;  %676 = vst.msk [vmem:[%s1185_s16 + $0x30] sm:$0xff] %vm605_vm3, %v635_v20 }
 0x192   : > { %677 = vst.msk [vmem:[%s1185_s16 + $0x38] sm:$0xff] %vm605_vm3, %v637_v19 }
 0x194   : > { %v651_v22 = vpop.permute.xlu0 %650 }
 0x195   : > { %v653_v21 = vpop.permute.xlu1 %652  ;;  %684 = vst.msk [vmem:[%s1185_s16 + $0x70] sm:$0xff] %vm605_vm3, %v651_v22 }
 0x196   : > { %685 = vst.msk [vmem:[%s1185_s16 + $0x78] sm:$0xff] %vm605_vm3, %v653_v21 }
 0x197 PF: > { %s15_s15 = sadd.s32 1, %s954_s15  }
 0x198   : > { %p12_p4 = scmp.ge.s32.totalorder %s15_s15, 4  }
 0x19a   :  { %14 = sbr.rel (!%p12_p4) target bundleno = 1 (0x1), region = 82 }

</bundles_post_ra>
